<compile_context>
chip_gen: v7x
topology: tpu7x:2x2x1
jax: 0.10.0
libtpu: 0.0.40
codegen_flags: <defaults>
</compile_context>

<pallas_src>
import jax
import jax.numpy as jnp
from jax.experimental import pallas as pl
from jax.experimental.pallas import tpu as pltpu

HIDDEN = 50
NEG_SLOPE = 0.01  # PyTorch nn.LeakyReLU default
LANE = 128
SUBLANE = 8


def _round_up(x, m):
    return (x + m - 1) // m * m


def _largest_divisor_tile(b_pad, cap):
    """Largest TB that is a multiple of SUBLANE, divides b_pad, and is <= cap."""
    m = b_pad // SUBLANE
    cap_d = max(1, cap // SUBLANE)
    best = 1
    d = 1
    while d * d <= m:
        if m % d == 0:
            if d <= cap_d and d > best:
                best = d
            q = m // d
            if q <= cap_d and q > best:
                best = q
        d += 1
    return best * SUBLANE


def _mlp_kernel(x_ref, w1_ref, b1_ref, w2_ref, b2_ref, o_ref):
    # x:  (TB, D_in) bf16     w1: (D_in, H_pad) bf16    b1: (1, H_pad) f32
    # w2: (H_pad, C_pad) bf16 b2: (1, C_pad) f32        o:  (TB, C_pad) bf16
    x = x_ref[...]
    h = jnp.dot(x, w1_ref[...], preferred_element_type=jnp.float32) + b1_ref[...]
    # LeakyReLU in f32 (v5e VPU has no bf16 elementwise path).
    h = jnp.where(h > 0, h, NEG_SLOPE * h)
    h = h.astype(w2_ref.dtype)  # back to bf16 for the second MXU dot
    out = jnp.dot(h, w2_ref[...], preferred_element_type=jnp.float32) + b2_ref[...]
    o_ref[...] = out.astype(o_ref.dtype)  # lane-dense bf16 store (C_pad = 128)


def prepare_params(w1, b1, w2, b2):
    """One-time prep: transpose to (in, out), pad HIDDEN/C to 128 lanes, cast to bf16.

    w1: (50, D_in), b1: (50,), w2: (C, 50), b2: (C,).
    Zero-padding is exact: padded hidden units get bias 0, LeakyReLU(0)=0, and
    their rows in w2 are 0; padded output columns are sliced off by the wrapper.
    """
    D_in = w1.shape[1]
    C = w2.shape[0]
    H_pad = _round_up(HIDDEN, LANE)
    C_pad = _round_up(C, LANE)

    w1_t = jnp.zeros((D_in, H_pad), jnp.float32).at[:, :HIDDEN].set(
        jnp.asarray(w1, jnp.float32).T)
    b1_r = jnp.zeros((1, H_pad), jnp.float32).at[:, :HIDDEN].set(
        jnp.asarray(b1, jnp.float32))
    w2_t = jnp.zeros((H_pad, C_pad), jnp.float32).at[:HIDDEN, :C].set(
        jnp.asarray(w2, jnp.float32).T)
    b2_r = jnp.zeros((1, C_pad), jnp.float32).at[:, :C].set(
        jnp.asarray(b2, jnp.float32))

    return (w1_t.astype(jnp.bfloat16), b1_r, w2_t.astype(jnp.bfloat16), b2_r, C)


def nn_forward(x, params, trim=True):
    """x: (B, D_in) float; params: output of prepare_params.

    Returns (B, C) bf16 (trim=True) or the padded (B_pad, C_pad) bf16 block
    (trim=False, saves a full extra pass over the output in XLA if the consumer
    can handle padding).
    """
    w1_t, b1_r, w2_t, b2_r, C = params
    B, D_in = x.shape
    H_pad = w1_t.shape[1]
    C_pad = w2_t.shape[1]

    # ---- chip VMEM capacity (v7x: 64 MiB/TC, v5e/v6e: 128 MiB) ----
    try:
        vmem_cap = int(pltpu.get_tpu_info().vmem_capacity_bytes)
    except Exception:
        vmem_cap = 64 << 20  # conservative default (v7x per-TC figure)

    weight_bytes = (w1_t.size + w2_t.size) * 2 + (b1_r.size + b2_r.size) * 4
    # Streamed per-row bytes: double-buffered bf16 x tile + double-buffered bf16 out tile.
    per_row_bytes = 2 * (D_in * 2) + 2 * (C_pad * 2)
    # Streaming budget after subtracting resident weights (worst case: double-buffered).
    stream_budget = max(int(vmem_cap * 0.45) - 2 * weight_bytes, 2 << 20)
    tb_fit = max(SUBLANE, (stream_budget // per_row_bytes) // SUBLANE * SUBLANE)

    # ---- batch tiling: pad B only to a multiple of 8, TB must divide B_pad ----
    B_pad = _round_up(B, SUBLANE)
    cap = min(1024 if vmem_cap >= (96 << 20) else 512, tb_fit)
    if B_pad >= 2 * SUBLANE:
        # Guarantee >= 2 grid programs so the "parallel" batch axis can feed both
        # TensorCores on v7x (negligible cost on single-TC v5e/v6e).
        cap = min(cap, max(SUBLANE, B_pad // 2))
    TB = _largest_divisor_tile(B_pad, cap)

    x_bf = x.astype(jnp.bfloat16)
    if B_pad != B:
        x_bf = jnp.pad(x_bf, ((0, B_pad - B), (0, 0)))

    vmem_need = TB * per_row_bytes + 2 * weight_bytes
    vmem_limit = int(min(max(2 * vmem_need, 16 << 20), (vmem_cap * 5) // 8))

    flops = 2 * B_pad * (D_in * H_pad + H_pad * C_pad)
    bytes_accessed = x_bf.size * 2 + weight_bytes + B_pad * C_pad * 2

    def _run(single_buffer_weights):
        # Constant-index_map (resident) operands: request single buffering.
        resident = (
            dict(pipeline_mode=pl.Buffered(1)) if single_buffer_weights else {})
        return pl.pallas_call(
            _mlp_kernel,
            out_shape=jax.ShapeDtypeStruct((B_pad, C_pad), jnp.bfloat16),
            grid=(B_pad // TB,),
            in_specs=[
                pl.BlockSpec((TB, D_in), lambda i: (i, 0)),            # streamed
                pl.BlockSpec((D_in, H_pad), lambda i: (0, 0), **resident),
                pl.BlockSpec((1, H_pad), lambda i: (0, 0), **resident),
                pl.BlockSpec((H_pad, C_pad), lambda i: (0, 0), **resident),
                pl.BlockSpec((1, C_pad), lambda i: (0, 0), **resident),
            ],
            out_specs=pl.BlockSpec((TB, C_pad), lambda i: (i, 0)),
            compiler_params=pltpu.CompilerParams(
                dimension_semantics=("parallel",),  # shard batch across TCs on v7x
                vmem_limit_bytes=vmem_limit,
            ),
            cost_estimate=pl.CostEstimate(
                flops=flops, transcendentals=0, bytes_accessed=bytes_accessed),
        )(x_bf, w1_t, b1_r, w2_t, b2_r)

    try:
        out = _run(single_buffer_weights=True)
    except Exception:
        # Fallback if this JAX/Mosaic build rejects pipeline_mode=pl.Buffered(1).
        out = _run(single_buffer_weights=False)

    if trim:
        return out[:B, :C]
    return out


def init_params(key, input_size, num_classes):
    """Deterministic init mimicking PyTorch nn.Linear (uniform ±1/sqrt(fan_in))."""
    k1, k2, k3, k4 = jax.random.split(key, 4)
    bound1 = 1.0 / (input_size ** 0.5)
    bound2 = 1.0 / (HIDDEN ** 0.5)
    w1 = jax.random.uniform(k1, (HIDDEN, input_size), jnp.float32, -bound1, bound1)
    b1 = jax.random.uniform(k2, (HIDDEN,), jnp.float32, -bound1, bound1)
    w2 = jax.random.uniform(k3, (num_classes, HIDDEN), jnp.float32, -bound2, bound2)
    b2 = jax.random.uniform(k4, (num_classes,), jnp.float32, -bound2, bound2)
    return w1, b1, w2, b2


if __name__ == "__main__":
    batch, input_size, num_classes = 8, 32, 10
    key = jax.random.PRNGKey(0)
    kx, kp = jax.random.split(key)
    x = jax.random.normal(kx, (batch, input_size), jnp.float32)
    w1, b1, w2, b2 = init_params(kp, input_size, num_classes)

    params = prepare_params(w1, b1, w2, b2)   # one-time weight prep (hoisted)
    out = nn_forward(x, params)
    jax.block_until_ready(out)

    # Pure-JAX f32 reference of the same semantics.
    h_ref = x @ w1.T + b1
    h_ref = jnp.where(h_ref > 0, h_ref, NEG_SLOPE * h_ref)
    ref = h_ref @ w2.T + b2
    assert out.shape == (batch, num_classes)
    # bf16 inputs/weights/output -> loosened tolerance (expected precision change).
    out_f32 = out.astype(jnp.float32)
    assert jnp.allclose(out_f32, ref, atol=3e-2, rtol=3e-2), \
        float(jnp.max(jnp.abs(out_f32 - ref)))

    print("KERNEL_OK")
</pallas_src>

<mosaic_0001>
module attributes {stable_mosaic.version = 11 : i64} {
  func.func @_mlp_kernel(%arg0: i32, %arg1: memref<8x32xbf16, #tpu.memory_space<vmem>>, %arg2: memref<32x128xbf16, #tpu.memory_space<vmem>>, %arg3: memref<1x128xf32, #tpu.memory_space<vmem>>, %arg4: memref<128x128xbf16, #tpu.memory_space<vmem>>, %arg5: memref<1x128xf32, #tpu.memory_space<vmem>>, %arg6: memref<8x128xbf16, #tpu.memory_space<vmem>>) attributes {dimension_semantics = [#tpu.dimension_semantics<parallel>], iteration_bounds = array<i64: 1>, scalar_prefetch = 0 : i64, scratch_operands = 0 : i64, tpu.core_type = #tpu.core_type<tc>, window_params = [{transform_indices = @transform_0, window_bounds = array<i64: 8, 32>}, {pipeline_mode = #tpu.pipeline_mode<synchronous>, transform_indices = @transform_1, window_bounds = array<i64: 32, 128>}, {pipeline_mode = #tpu.pipeline_mode<synchronous>, transform_indices = @transform_2, window_bounds = array<i64: 1, 128>}, {pipeline_mode = #tpu.pipeline_mode<synchronous>, transform_indices = @transform_3, window_bounds = array<i64: 128, 128>}, {pipeline_mode = #tpu.pipeline_mode<synchronous>, transform_indices = @transform_4, window_bounds = array<i64: 1, 128>}, {transform_indices = @transform_5, window_bounds = array<i64: 8, 128>}]} {
    %c0 = arith.constant 0 : index
    %c0_0 = arith.constant 0 : index
    %0 = vector.load %arg1[%c0, %c0_0] : memref<8x32xbf16, #tpu.memory_space<vmem>>, vector<8x32xbf16>
    %c0_1 = arith.constant 0 : index
    %c0_2 = arith.constant 0 : index
    %1 = vector.load %arg2[%c0_1, %c0_2] : memref<32x128xbf16, #tpu.memory_space<vmem>>, vector<32x128xbf16>
    %cst = arith.constant dense<0.000000e+00> : vector<8x128xf32>
    %2 = tpu.matmul %0, %1, %cst {dimension_numbers = #tpu.dot_dimension_numbers<[1], [0], [0], [1], [0, 0, 1, 1], [], []>} : vector<8x32xbf16>, vector<32x128xbf16>, vector<8x128xf32> -> vector<8x128xf32>
    %c0_3 = arith.constant 0 : index
    %c0_4 = arith.constant 0 : index
    %3 = vector.load %arg3[%c0_3, %c0_4] : memref<1x128xf32, #tpu.memory_space<vmem>>, vector<1x128xf32>
    %4 = vector.broadcast %3 : vector<1x128xf32> to vector<8x128xf32>
    %5 = arith.addf %2, %4 : vector<8x128xf32>
    %cst_5 = arith.constant 0.000000e+00 : f32
    %6 = vector.broadcast %cst_5 : f32 to vector<8x128xf32>
    %7 = arith.cmpf ogt, %5, %6 : vector<8x128xf32>
    %cst_6 = arith.constant 0.00999999977 : f32
    %8 = vector.broadcast %cst_6 : f32 to vector<8x128xf32>
    %9 = arith.mulf %8, %5 : vector<8x128xf32>
    %10 = arith.select %7, %5, %9 : vector<8x128xi1>, vector<8x128xf32>
    %11 = arith.truncf %10 : vector<8x128xf32> to vector<8x128xbf16>
    %c0_7 = arith.constant 0 : index
    %c0_8 = arith.constant 0 : index
    %12 = vector.load %arg4[%c0_7, %c0_8] : memref<128x128xbf16, #tpu.memory_space<vmem>>, vector<128x128xbf16>
    %cst_9 = arith.constant dense<0.000000e+00> : vector<8x128xf32>
    %13 = tpu.matmul %11, %12, %cst_9 {dimension_numbers = #tpu.dot_dimension_numbers<[1], [0], [0], [1], [0, 0, 1, 1], [], []>} : vector<8x128xbf16>, vector<128x128xbf16>, vector<8x128xf32> -> vector<8x128xf32>
    %c0_10 = arith.constant 0 : index
    %c0_11 = arith.constant 0 : index
    %14 = vector.load %arg5[%c0_10, %c0_11] : memref<1x128xf32, #tpu.memory_space<vmem>>, vector<1x128xf32>
    %15 = vector.broadcast %14 : vector<1x128xf32> to vector<8x128xf32>
    %16 = arith.addf %13, %15 : vector<8x128xf32>
    %17 = arith.truncf %16 : vector<8x128xf32> to vector<8x128xbf16>
    %c0_12 = arith.constant 0 : index
    %c0_13 = arith.constant 0 : index
    %18 = vector.load %arg6[%c0_12, %c0_13] : memref<8x128xbf16, #tpu.memory_space<vmem>>, vector<8x128xbf16>
    tpu.vector_store %arg6[%c0_12, %c0_13], %17 {strides = array<i32>} : memref<8x128xbf16, #tpu.memory_space<vmem>>, vector<8x128xbf16>,
    return
  }
  func.func @transform_0(%arg0: i32) -> (i32, i32) {
    %c0_i32 = arith.constant 0 : i32
    %c0_i32_0 = arith.constant 0 : i32
    return %arg0, %c0_i32 : i32, i32
  }
  func.func @transform_1(%arg0: i32) -> (i32, i32) {
    %c0_i32 = arith.constant 0 : i32
    %c0_i32_0 = arith.constant 0 : i32
    %c0_i32_1 = arith.constant 0 : i32
    return %c0_i32, %c0_i32_0 : i32, i32
  }
  func.func @transform_2(%arg0: i32) -> (i32, i32) {
    %c0_i32 = arith.constant 0 : i32
    %c0_i32_0 = arith.constant 0 : i32
    %c0_i32_1 = arith.constant 0 : i32
    return %c0_i32, %c0_i32_0 : i32, i32
  }
  func.func @transform_3(%arg0: i32) -> (i32, i32) {
    %c0_i32 = arith.constant 0 : i32
    %c0_i32_0 = arith.constant 0 : i32
    %c0_i32_1 = arith.constant 0 : i32
    return %c0_i32, %c0_i32_0 : i32, i32
  }
  func.func @transform_4(%arg0: i32) -> (i32, i32) {
    %c0_i32 = arith.constant 0 : i32
    %c0_i32_0 = arith.constant 0 : i32
    %c0_i32_1 = arith.constant 0 : i32
    return %c0_i32, %c0_i32_0 : i32, i32
  }
  func.func @transform_5(%arg0: i32) -> (i32, i32) {
    %c0_i32 = arith.constant 0 : i32
    %c0_i32_0 = arith.constant 0 : i32
    return %arg0, %c0_i32 : i32, i32
  }
}

module attributes {stable_mosaic.version = 11 : i64} {
  func.func @_mlp_kernel(%arg0: i32, %arg1: memref<8x32xbf16, #tpu.memory_space<vmem>>, %arg2: memref<32x128xbf16, #tpu.memory_space<vmem>>, %arg3: memref<1x128xf32, #tpu.memory_space<vmem>>, %arg4: memref<128x128xbf16, #tpu.memory_space<vmem>>, %arg5: memref<1x128xf32, #tpu.memory_space<vmem>>, %arg6: memref<8x128xbf16, #tpu.memory_space<vmem>>) attributes {dimension_semantics = [#tpu.dimension_semantics<parallel>], iteration_bounds = array<i64: 1>, scalar_prefetch = 0 : i64, scratch_operands = 0 : i64, tpu.core_type = #tpu.core_type<tc>, window_params = [{transform_indices = @transform_0, window_bounds = array<i64: 8, 32>}, {pipeline_mode = #tpu.pipeline_mode<synchronous>, transform_indices = @transform_1, window_bounds = array<i64: 32, 128>}, {pipeline_mode = #tpu.pipeline_mode<synchronous>, transform_indices = @transform_2, window_bounds = array<i64: 1, 128>}, {pipeline_mode = #tpu.pipeline_mode<synchronous>, transform_indices = @transform_3, window_bounds = array<i64: 128, 128>}, {pipeline_mode = #tpu.pipeline_mode<synchronous>, transform_indices = @transform_4, window_bounds = array<i64: 1, 128>}, {transform_indices = @transform_5, window_bounds = array<i64: 8, 128>}]} {
    %c0 = arith.constant 0 : index
    %c0_0 = arith.constant 0 : index
    %0 = vector.load %arg1[%c0, %c0_0] : memref<8x32xbf16, #tpu.memory_space<vmem>>, vector<8x32xbf16>
    %c0_1 = arith.constant 0 : index
    %c0_2 = arith.constant 0 : index
    %1 = vector.load %arg2[%c0_1, %c0_2] : memref<32x128xbf16, #tpu.memory_space<vmem>>, vector<32x128xbf16>
    %cst = arith.constant dense<0.000000e+00> : vector<8x128xf32>
    %2 = tpu.matmul %0, %1, %cst {dimension_numbers = #tpu.dot_dimension_numbers<[1], [0], [0], [1], [0, 0, 1, 1], [], []>} : vector<8x32xbf16>, vector<32x128xbf16>, vector<8x128xf32> -> vector<8x128xf32>
    %c0_3 = arith.constant 0 : index
    %c0_4 = arith.constant 0 : index
    %3 = vector.load %arg3[%c0_3, %c0_4] : memref<1x128xf32, #tpu.memory_space<vmem>>, vector<1x128xf32>
    %4 = vector.broadcast %3 : vector<1x128xf32> to vector<8x128xf32>
    %5 = arith.addf %2, %4 : vector<8x128xf32>
    %cst_5 = arith.constant 0.000000e+00 : f32
    %6 = vector.broadcast %cst_5 : f32 to vector<8x128xf32>
    %7 = arith.cmpf ogt, %5, %6 : vector<8x128xf32>
    %cst_6 = arith.constant 0.00999999977 : f32
    %8 = vector.broadcast %cst_6 : f32 to vector<8x128xf32>
    %9 = arith.mulf %8, %5 : vector<8x128xf32>
    %10 = arith.select %7, %5, %9 : vector<8x128xi1>, vector<8x128xf32>
    %11 = arith.truncf %10 : vector<8x128xf32> to vector<8x128xbf16>
    %c0_7 = arith.constant 0 : index
    %c0_8 = arith.constant 0 : index
    %12 = vector.load %arg4[%c0_7, %c0_8] : memref<128x128xbf16, #tpu.memory_space<vmem>>, vector<128x128xbf16>
    %cst_9 = arith.constant dense<0.000000e+00> : vector<8x128xf32>
    %13 = tpu.matmul %11, %12, %cst_9 {dimension_numbers = #tpu.dot_dimension_numbers<[1], [0], [0], [1], [0, 0, 1, 1], [], []>} : vector<8x128xbf16>, vector<128x128xbf16>, vector<8x128xf32> -> vector<8x128xf32>
    %c0_10 = arith.constant 0 : index
    %c0_11 = arith.constant 0 : index
    %14 = vector.load %arg5[%c0_10, %c0_11] : memref<1x128xf32, #tpu.memory_space<vmem>>, vector<1x128xf32>
    %15 = vector.broadcast %14 : vector<1x128xf32> to vector<8x128xf32>
    %16 = arith.addf %13, %15 : vector<8x128xf32>
    %17 = arith.truncf %16 : vector<8x128xf32> to vector<8x128xbf16>
    %c0_12 = arith.constant 0 : index
    %c0_13 = arith.constant 0 : index
    %18 = vector.load %arg6[%c0_12, %c0_13] : memref<8x128xbf16, #tpu.memory_space<vmem>>, vector<8x128xbf16>
    tpu.vector_store %arg6[%c0_12, %c0_13], %17 {strides = array<i32>} : memref<8x128xbf16, #tpu.memory_space<vmem>>, vector<8x128xbf16>,
    return
  }
  func.func @transform_0(%arg0: i32) -> (i32, i32) {
    %c0_i32 = arith.constant 0 : i32
    %c0_i32_0 = arith.constant 0 : i32
    return %arg0, %c0_i32 : i32, i32
  }
  func.func @transform_1(%arg0: i32) -> (i32, i32) {
    %c0_i32 = arith.constant 0 : i32
    %c0_i32_0 = arith.constant 0 : i32
    %c0_i32_1 = arith.constant 0 : i32
    return %c0_i32, %c0_i32_0 : i32, i32
  }
  func.func @transform_2(%arg0: i32) -> (i32, i32) {
    %c0_i32 = arith.constant 0 : i32
    %c0_i32_0 = arith.constant 0 : i32
    %c0_i32_1 = arith.constant 0 : i32
    return %c0_i32, %c0_i32_0 : i32, i32
  }
  func.func @transform_3(%arg0: i32) -> (i32, i32) {
    %c0_i32 = arith.constant 0 : i32
    %c0_i32_0 = arith.constant 0 : i32
    %c0_i32_1 = arith.constant 0 : i32
    return %c0_i32, %c0_i32_0 : i32, i32
  }
  func.func @transform_4(%arg0: i32) -> (i32, i32) {
    %c0_i32 = arith.constant 0 : i32
    %c0_i32_0 = arith.constant 0 : i32
    %c0_i32_1 = arith.constant 0 : i32
    return %c0_i32, %c0_i32_0 : i32, i32
  }
  func.func @transform_5(%arg0: i32) -> (i32, i32) {
    %c0_i32 = arith.constant 0 : i32
    %c0_i32_0 = arith.constant 0 : i32
    return %arg0, %c0_i32 : i32, i32
  }
}

</mosaic_0001>

<bundles_post_ra>
// kernel: tpu_custom_call.1
= control target key start
LH: loop header
LB: loop body
LE: loop exit
PB: predicated region body
PF: predicated region fallthrough
CT: control target
= control target key end

     0   :  { %10 = vsyncpa [#allocation3], 0  ;;  %s525_s0 = inlined_call_operand.hbm [shape: bf16[8,32], index: 0, kind: input, shape index: {}]   ;;  %s526_s1 = inlined_call_operand.hbm [shape: bf16[32,128], index: 1, kind: input, shape index: {}]   ;;  %s527_s2 = inlined_call_operand.vmem [shape: f32[1,128], index: 2, kind: input, shape index: {}]   ;;  %s528_s3 = inlined_call_operand.hbm [shape: bf16[128,128], index: 3, kind: input, shape index: {}]   ;;  %s529_s4 = inlined_call_operand.vmem [shape: f32[1,128], index: 4, kind: input, shape index: {}]   ;;  %s530_s5 = inlined_call_operand.hbm [shape: bf16[8,128], index: 5, kind: output, shape index: {}]  }
   0x1   :  { %11 = vsyncpa [#allocation6], 0 }
   0x2   :  { %12 = vsyncpa [#allocation4], 0  ;;  %s427_s18 = smov [#allocation5]   ;;  %s333_s22 = scalar_lea.hbm %s526_s1, 256 }
   0x3   :  { %s28_s19 = sshll.u32 %s427_s18, 4  ;;  %p334_p0 = scmp.ne.s32.totalorder %s526_s1, %s333_s22  ;;  %s29_s19 = int_to_ptr.vmem [resolvable:$true] %s28_s19 }
   0x4   :  { %p337_p1 = scmp.lt.u32.totalorder %s333_s22, %s526_s1 }
   0x6   :  { %p339_p2 = pnand %p337_p1, %p334_p0 }
   0x8   :  { %342 = shalt.err (!%p339_p2)
}
   0x9   :  { %s343_s27 = scalar_lea.vmem %s29_s19, 256  ;;  %p348_p4 = scmp.lt.s32.totalorder %s29_s19, %s29_s19 }
   0xa   :  { %p344_p3 = scmp.ne.s32.totalorder %s29_s19, %s343_s27  ;;  %p349_p5 = scmp.lt.s32.totalorder %s343_s27, %s343_s27 }
   0xc   :  { %p350_p6 = por %p349_p5, %p348_p4 }
   0xe   :  { %p351_p7 = pnand %p350_p6, %p344_p3 }
  0x10   :  { %354 = shalt.err (!%p351_p7)
}
  0x11   :  { %s428_s28 = smov 64   ;;  %s429_s29 = smov 4  }
  0x12   :  { %34 = dma.hbm_to_vmem [thread:$0]  %s526_s1, 256, %s29_s19, [#allocation6], %s428_s28, %s428_s28, %s429_s29  }
  0x13   :  { %s430_s7 = smov [#allocation2]   ;;  %s431_s9 = smov [#allocation7]  }
  0x14   :  { %s19_s8 = sshll.u32 %s430_s7, 4  ;;  %s42_s10 = sshll.u32 %s431_s9, 4  ;;  %s20_s8 = int_to_ptr.vmem [resolvable:$true] %s19_s8  ;;  %s43_s10 = int_to_ptr.vmem [resolvable:$true] %s42_s10 }
  0x15   :  { %s355_s13 = scalar_lea.hbm %s525_s0, 64 }
  0x16   :  { %p356_p8 = scmp.ne.s32.totalorder %s525_s0, %s355_s13  ;;  %p359_p9 = scmp.lt.u32.totalorder %s355_s13, %s525_s0 }
  0x18   :  { %p361_p10 = pnand %p359_p9, %p356_p8 }
  0x1a   :  { %364 = shalt.err (!%p361_p10)
}
  0x1b   :  { %s365_s1 = scalar_lea.vmem %s20_s8, 64  ;;  %p370_p12 = scmp.lt.s32.totalorder %s20_s8, %s20_s8 }
  0x1c   :  { %p366_p11 = scmp.ne.s32.totalorder %s20_s8, %s365_s1  ;;  %p371_p13 = scmp.lt.s32.totalorder %s365_s1, %s365_s1 }
  0x1e   :  { %p372_p0 = por %p371_p13, %p370_p12 }
  0x20   :  { %p373_p1 = pnand %p372_p0, %p366_p11 }
  0x22   :  { %376 = shalt.err (!%p373_p1)
}
  0x23   :  { %22 = dma.hbm_to_vmem [thread:$0]  %s525_s0, 64, %s20_s8, [#allocation3]  }
  0x24   :  { %s377_s22 = scalar_lea.hbm %s528_s3, 1024 }
  0x25   :  { %p378_p2 = scmp.ne.s32.totalorder %s528_s3, %s377_s22  ;;  %p381_p3 = scmp.lt.u32.totalorder %s377_s22, %s528_s3 }
  0x27   :  { %p383_p4 = pnand %p381_p3, %p378_p2 }
  0x29   :  { %386 = shalt.err (!%p383_p4)
}
  0x2a   :  { %s387_s27 = scalar_lea.vmem %s43_s10, 1024  ;;  %p392_p6 = scmp.lt.s32.totalorder %s43_s10, %s43_s10 }
  0x2b   :  { %p388_p5 = scmp.ne.s32.totalorder %s43_s10, %s387_s27  ;;  %p393_p7 = scmp.lt.s32.totalorder %s387_s27, %s387_s27 }
  0x2d   :  { %p394_p8 = por %p393_p7, %p392_p6 }
  0x2f   :  { %p395_p9 = pnand %p394_p8, %p388_p5 }
  0x31   :  { %398 = shalt.err (!%p395_p9)
}
  0x32   :  { %48 = dma.hbm_to_vmem [thread:$0]  %s528_s3, 1024, %s43_s10, [#allocation6], %s428_s28, %s428_s28, %s429_s29  }
  0x33   :  { %421 = dma.done.wait [#allocation3], 64  }
  0x34   :  { %422 = vsyncadd [#allocation3], 4294967232 }
  0x35   :  { %423 = dma.done.wait [#allocation6], 1280  }
  0x36   :  { %424 = vsyncadd [#allocation6], 4294966016  ;;  %v432_v0 = vmov 0.0   ;;  %vm433_vm0 = vmmov 0   ;;  %v323_v1 = vld [vmem:[#allocation5] sm:$0xff]   ;;  %v324_v2 = vld [vmem:[#allocation5 + $0x8] sm:$0xff]  }
  0x37   :  { %287 = vmatprep.subr.bf16.mxu0 %v432_v0  ;;  %291 = vmatprep.mubr.msk.bf16.mxu0 %vm433_vm0, %v432_v0  ;;  %v325_v3 = vld [vmem:[#allocation7] sm:$0xff]   ;;  %vm85_vm1 = vcmask 261120   ;;  %v326_v4 = vld [vmem:[#allocation7 + $0x8] sm:$0xff]   ;;  %v327_v6 = vld [vmem:[#allocation7 + $0x10] sm:$0xff]   ;;  %s434_s7 = smov [#allocation8]  }
  0x38   :  { %295 = vmatprep.subr.bf16.mxu1 %v432_v0  ;;  %311 = vmatprep.mubr.msk.bf16.mxu1 %vm433_vm0, %v432_v0  ;;  %v61_v5 = vld [vmem:[#allocation2] sm:$0xf]  ;;  %v328_v7 = vld [vmem:[#allocation7 + $0x18] sm:$0xff]   ;;  %v329_v8 = vld [vmem:[#allocation7 + $0x20] sm:$0xff]   ;;  %s252_s8 = sshll.u32 %s434_s7, 4  ;;  %s253_s8 = int_to_ptr.vmem [resolvable:$true] %s252_s8 }
  0x39   :  { %288 = vmatpush3.bf16.msra.mxu0 %v323_v1  ;;  %296 = vmatpush3.bf16.msra.mxu1 %v325_v3  ;;  %v330_v9 = vld [vmem:[#allocation7 + $0x28] sm:$0xff]   ;;  %v331_v10 = vld [vmem:[#allocation7 + $0x30] sm:$0xff]   ;;  %v332_v11 = vld [vmem:[#allocation7 + $0x38] sm:$0xff]   ;;  %p404_p11 = scmp.lt.s32.totalorder %s253_s8, %s253_s8 }
  0x3a   :  { %289 = vmatprep.subr.bf16.mxu0 %v432_v0  ;;  %297 = vmatprep.subr.bf16.mxu1 %v432_v0  ;;  %v262_v12 = vld [vmem:[%s527_s2] ss:$0 sm:$0xff]  ;;  %s399_s2 = scalar_lea.vmem %s253_s8, 64 }
  0x3b   :  { %v266_v21 = vld [vmem:[%s529_s4] ss:$0 sm:$0xff]  ;;  %p400_p10 = scmp.ne.s32.totalorder %s253_s8, %s399_s2  ;;  %p405_p12 = scmp.lt.s32.totalorder %s399_s2, %s399_s2 }
  0x3d   :  { %290 = vmatpush3.bf16.msra.mxu0 %v324_v2  ;;  %298 = vmatpush3.bf16.msra.mxu1 %v326_v4  ;;  %p406_p13 = por %p405_p12, %p404_p11 }
  0x3e   :  { %299 = vmatprep.subr.bf16.mxu1 %v432_v0 }
  0x3f   :  { %p407_p0 = pnand %p406_p13, %p400_p10 }
  0x40   :  { %292 = vmatmul.mubr.msk.bf16.vlgmr.msra.gmra.mrb[0].mxu0 %vm85_vm1, %v61_v5 }
  0x41   :  { %300 = vmatpush3.bf16.msra.mxu1 %v327_v6 }
  0x42   :  { %301 = vmatprep.subr.bf16.mxu1 %v432_v0 }
  0x45   :  { %302 = vmatpush3.bf16.msra.mxu1 %v328_v7 }
  0x46   :  { %303 = vmatprep.subr.bf16.mxu1 %v432_v0 }
  0x49   :  { %304 = vmatpush3.bf16.msra.mxu1 %v329_v8 }
  0x4a   :  { %305 = vmatprep.subr.bf16.mxu1 %v432_v0 }
  0x4d   :  { %306 = vmatpush3.bf16.msra.mxu1 %v330_v9 }
  0x4e   :  { %307 = vmatprep.subr.bf16.mxu1 %v432_v0 }
  0x51   :  { %308 = vmatpush3.bf16.msra.mxu1 %v331_v10 }
  0x52   :  { %309 = vmatprep.subr.bf16.mxu1 %v432_v0 }
  0x55   :  { %310 = vmatpush3.bf16.msra.mxu1 %v332_v11 }
 0x113   :  { %v123_v13 = vpop.f32.mrb[0].mxu0 }
 0x114   :  { %v124_v14 = vadd.f32 %v262_v12, %v123_v13  ;;  %v293_v15 = vpop.f32.mrb[1].mxu0 }
 0x115   :  { %v126_v16 = vpop.f32.mrb[2].mxu0 }
 0x116   :  { %vm129_vm2 = vcmp.gt.f32.partialorder %v124_v14, 0.0  ;;  %v130_v17 = vmul.f32 0.01, %v124_v14  ;;  %v294_v18 = vpop.f32.mrb[3].mxu0 }
 0x118   :  { %v131_v19 = vsel %vm129_vm2, %v124_v14, %v130_v17 }
 0x119   :  { %v132_v20 = vpack.c.bf16 %v131_v19, %v131_v19 }
 0x11b   :  { %312 = vmatmul.mubr.bf16.vlgmr.msra.gmra.mrb[0].mxu1 %v132_v20 }
 0x1ee   :  { %v238_v22 = vpop.f32.mrb[0].mxu1 }
 0x1ef   :  { %v239_v23 = vadd.f32 %v266_v21, %v238_v22  ;;  %v313_v24 = vpop.f32.mrb[1].mxu1 }
 0x1f0   :  { %v241_v25 = vpop.f32.mrb[2].mxu1 }
 0x1f1   :  { %v244_v26 = vpack.c.bf16 %v239_v23, %v239_v23  ;;  %v314_v27 = vpop.f32.mrb[3].mxu1 }
 0x1f3   :  { %245 = vst [vmem:[#allocation8] sm:$0xf] %v244_v26 }
 0x1f4   :  { %410 = shalt.err (!%p407_p0)
}
 0x1f5   :  { %s411_s4 = scalar_lea.hbm %s530_s5, 64 }
 0x1f6   :  { %p412_p1 = scmp.ne.s32.totalorder %s530_s5, %s411_s4  ;;  %p415_p2 = scmp.lt.u32.totalorder %s411_s4, %s530_s5 }
 0x1f8   :  { %p417_p3 = pnand %p415_p2, %p412_p1 }
 0x1fa   :  { %420 = shalt.err (!%p417_p3)
}
 0x1fb   :  { %255 = dma.vmem_to_hbm [thread:$0]  %s253_s8, 64, %s530_s5, [#allocation4]  }
 0x1fc   :  { %425 = dma.done.wait [#allocation4], 64  }
 0x1fd   :  { %426 = vsyncadd [#allocation4], 4294967232 }
 0x1fe   :  { %259 = vsyncpa [#allocation3], 1 }
 0x1ff   :  { %260 = vsyncpa [#allocation6], 1 }
 0x200   :  { %261 = vsyncpa [#allocation4], 1 }

// kernel: tpu_custom_call.1
= control target key start
LH: loop header
LB: loop body
LE: loop exit
PB: predicated region body
PF: predicated region fallthrough
CT: control target
= control target key end

     0   :  { %10 = vsyncpa [#allocation3], 0  ;;  %s525_s0 = inlined_call_operand.hbm [shape: bf16[8,32], index: 0, kind: input, shape index: {}]   ;;  %s526_s1 = inlined_call_operand.hbm [shape: bf16[32,128], index: 1, kind: input, shape index: {}]   ;;  %s527_s2 = inlined_call_operand.vmem [shape: f32[1,128], index: 2, kind: input, shape index: {}]   ;;  %s528_s3 = inlined_call_operand.hbm [shape: bf16[128,128], index: 3, kind: input, shape index: {}]   ;;  %s529_s4 = inlined_call_operand.vmem [shape: f32[1,128], index: 4, kind: input, shape index: {}]   ;;  %s530_s5 = inlined_call_operand.hbm [shape: bf16[8,128], index: 5, kind: output, shape index: {}]  }
   0x1   :  { %11 = vsyncpa [#allocation6], 0 }
   0x2   :  { %12 = vsyncpa [#allocation4], 0  ;;  %s427_s18 = smov [#allocation5]   ;;  %s333_s22 = scalar_lea.hbm %s526_s1, 256 }
   0x3   :  { %s28_s19 = sshll.u32 %s427_s18, 4  ;;  %p334_p0 = scmp.ne.s32.totalorder %s526_s1, %s333_s22  ;;  %s29_s19 = int_to_ptr.vmem [resolvable:$true] %s28_s19 }
   0x4   :  { %p337_p1 = scmp.lt.u32.totalorder %s333_s22, %s526_s1 }
   0x6   :  { %p339_p2 = pnand %p337_p1, %p334_p0 }
   0x8   :  { %342 = shalt.err (!%p339_p2)
}
   0x9   :  { %s343_s27 = scalar_lea.vmem %s29_s19, 256  ;;  %p348_p4 = scmp.lt.s32.totalorder %s29_s19, %s29_s19 }
   0xa   :  { %p344_p3 = scmp.ne.s32.totalorder %s29_s19, %s343_s27  ;;  %p349_p5 = scmp.lt.s32.totalorder %s343_s27, %s343_s27 }
   0xc   :  { %p350_p6 = por %p349_p5, %p348_p4 }
   0xe   :  { %p351_p7 = pnand %p350_p6, %p344_p3 }
  0x10   :  { %354 = shalt.err (!%p351_p7)
}
  0x11   :  { %s428_s28 = smov 64   ;;  %s429_s29 = smov 4  }
  0x12   :  { %34 = dma.hbm_to_vmem [thread:$0]  %s526_s1, 256, %s29_s19, [#allocation6], %s428_s28, %s428_s28, %s429_s29  }
  0x13   :  { %s430_s7 = smov [#allocation2]   ;;  %s431_s9 = smov [#allocation7]  }
  0x14   :  { %s19_s8 = sshll.u32 %s430_s7, 4  ;;  %s42_s10 = sshll.u32 %s431_s9, 4  ;;  %s20_s8 = int_to_ptr.vmem [resolvable:$true] %s19_s8  ;;  %s43_s10 = int_to_ptr.vmem [resolvable:$true] %s42_s10 }
  0x15   :  { %s355_s13 = scalar_lea.hbm %s525_s0, 64 }
  0x16   :  { %p356_p8 = scmp.ne.s32.totalorder %s525_s0, %s355_s13  ;;  %p359_p9 = scmp.lt.u32.totalorder %s355_s13, %s525_s0 }
  0x18   :  { %p361_p10 = pnand %p359_p9, %p356_p8 }
  0x1a   :  { %364 = shalt.err (!%p361_p10)
}
  0x1b   :  { %s365_s1 = scalar_lea.vmem %s20_s8, 64  ;;  %p370_p12 = scmp.lt.s32.totalorder %s20_s8, %s20_s8 }
  0x1c   :  { %p366_p11 = scmp.ne.s32.totalorder %s20_s8, %s365_s1  ;;  %p371_p13 = scmp.lt.s32.totalorder %s365_s1, %s365_s1 }
  0x1e   :  { %p372_p0 = por %p371_p13, %p370_p12 }
  0x20   :  { %p373_p1 = pnand %p372_p0, %p366_p11 }
  0x22   :  { %376 = shalt.err (!%p373_p1)
}
  0x23   :  { %22 = dma.hbm_to_vmem [thread:$0]  %s525_s0, 64, %s20_s8, [#allocation3]  }
  0x24   :  { %s377_s22 = scalar_lea.hbm %s528_s3, 1024 }
  0x25   :  { %p378_p2 = scmp.ne.s32.totalorder %s528_s3, %s377_s22  ;;  %p381_p3 = scmp.lt.u32.totalorder %s377_s22, %s528_s3 }
  0x27   :  { %p383_p4 = pnand %p381_p3, %p378_p2 }
  0x29   :  { %386 = shalt.err (!%p383_p4)
}
  0x2a   :  { %s387_s27 = scalar_lea.vmem %s43_s10, 1024  ;;  %p392_p6 = scmp.lt.s32.totalorder %s43_s10, %s43_s10 }
  0x2b   :  { %p388_p5 = scmp.ne.s32.totalorder %s43_s10, %s387_s27  ;;  %p393_p7 = scmp.lt.s32.totalorder %s387_s27, %s387_s27 }
  0x2d   :  { %p394_p8 = por %p393_p7, %p392_p6 }
  0x2f   :  { %p395_p9 = pnand %p394_p8, %p388_p5 }
  0x31   :  { %398 = shalt.err (!%p395_p9)
}
  0x32   :  { %48 = dma.hbm_to_vmem [thread:$0]  %s528_s3, 1024, %s43_s10, [#allocation6], %s428_s28, %s428_s28, %s429_s29  }
  0x33   :  { %421 = dma.done.wait [#allocation3], 64  }
  0x34   :  { %422 = vsyncadd [#allocation3], 4294967232 }
  0x35   :  { %423 = dma.done.wait [#allocation6], 1280  }
  0x36   :  { %424 = vsyncadd [#allocation6], 4294966016  ;;  %v432_v0 = vmov 0.0   ;;  %vm433_vm0 = vmmov 0   ;;  %v323_v1 = vld [vmem:[#allocation5] sm:$0xff]   ;;  %v324_v2 = vld [vmem:[#allocation5 + $0x8] sm:$0xff]  }
  0x37   :  { %287 = vmatprep.subr.bf16.mxu0 %v432_v0  ;;  %291 = vmatprep.mubr.msk.bf16.mxu0 %vm433_vm0, %v432_v0  ;;  %v325_v3 = vld [vmem:[#allocation7] sm:$0xff]   ;;  %vm85_vm1 = vcmask 261120   ;;  %v326_v4 = vld [vmem:[#allocation7 + $0x8] sm:$0xff]   ;;  %v327_v6 = vld [vmem:[#allocation7 + $0x10] sm:$0xff]   ;;  %s434_s7 = smov [#allocation8]  }
  0x38   :  { %295 = vmatprep.subr.bf16.mxu1 %v432_v0  ;;  %311 = vmatprep.mubr.msk.bf16.mxu1 %vm433_vm0, %v432_v0  ;;  %v61_v5 = vld [vmem:[#allocation2] sm:$0xf]  ;;  %v328_v7 = vld [vmem:[#allocation7 + $0x18] sm:$0xff]   ;;  %v329_v8 = vld [vmem:[#allocation7 + $0x20] sm:$0xff]   ;;  %s252_s8 = sshll.u32 %s434_s7, 4  ;;  %s253_s8 = int_to_ptr.vmem [resolvable:$true] %s252_s8 }
  0x39   :  { %288 = vmatpush3.bf16.msra.mxu0 %v323_v1  ;;  %296 = vmatpush3.bf16.msra.mxu1 %v325_v3  ;;  %v330_v9 = vld [vmem:[#allocation7 + $0x28] sm:$0xff]   ;;  %v331_v10 = vld [vmem:[#allocation7 + $0x30] sm:$0xff]   ;;  %v332_v11 = vld [vmem:[#allocation7 + $0x38] sm:$0xff]   ;;  %p404_p11 = scmp.lt.s32.totalorder %s253_s8, %s253_s8 }
  0x3a   :  { %289 = vmatprep.subr.bf16.mxu0 %v432_v0  ;;  %297 = vmatprep.subr.bf16.mxu1 %v432_v0  ;;  %v262_v12 = vld [vmem:[%s527_s2] ss:$0 sm:$0xff]  ;;  %s399_s2 = scalar_lea.vmem %s253_s8, 64 }
  0x3b   :  { %v266_v21 = vld [vmem:[%s529_s4] ss:$0 sm:$0xff]  ;;  %p400_p10 = scmp.ne.s32.totalorder %s253_s8, %s399_s2  ;;  %p405_p12 = scmp.lt.s32.totalorder %s399_s2, %s399_s2 }
  0x3d   :  { %290 = vmatpush3.bf16.msra.mxu0 %v324_v2  ;;  %298 = vmatpush3.bf16.msra.mxu1 %v326_v4  ;;  %p406_p13 = por %p405_p12, %p404_p11 }
  0x3e   :  { %299 = vmatprep.subr.bf16.mxu1 %v432_v0 }
  0x3f   :  { %p407_p0 = pnand %p406_p13, %p400_p10 }
  0x40   :  { %292 = vmatmul.mubr.msk.bf16.vlgmr.msra.gmra.mrb[0].mxu0 %vm85_vm1, %v61_v5 }
  0x41   :  { %300 = vmatpush3.bf16.msra.mxu1 %v327_v6 }
  0x42   :  { %301 = vmatprep.subr.bf16.mxu1 %v432_v0 }
  0x45   :  { %302 = vmatpush3.bf16.msra.mxu1 %v328_v7 }
  0x46   :  { %303 = vmatprep.subr.bf16.mxu1 %v432_v0 }
  0x49   :  { %304 = vmatpush3.bf16.msra.mxu1 %v329_v8 }
  0x4a   :  { %305 = vmatprep.subr.bf16.mxu1 %v432_v0 }
  0x4d   :  { %306 = vmatpush3.bf16.msra.mxu1 %v330_v9 }
  0x4e   :  { %307 = vmatprep.subr.bf16.mxu1 %v432_v0 }
  0x51   :  { %308 = vmatpush3.bf16.msra.mxu1 %v331_v10 }
  0x52   :  { %309 = vmatprep.subr.bf16.mxu1 %v432_v0 }
  0x55   :  { %310 = vmatpush3.bf16.msra.mxu1 %v332_v11 }
 0x113   :  { %v123_v13 = vpop.f32.mrb[0].mxu0 }
 0x114   :  { %v124_v14 = vadd.f32 %v262_v12, %v123_v13  ;;  %v293_v15 = vpop.f32.mrb[1].mxu0 }
 0x115   :  { %v126_v16 = vpop.f32.mrb[2].mxu0 }
 0x116   :  { %vm129_vm2 = vcmp.gt.f32.partialorder %v124_v14, 0.0  ;;  %v130_v17 = vmul.f32 0.01, %v124_v14  ;;  %v294_v18 = vpop.f32.mrb[3].mxu0 }
 0x118   :  { %v131_v19 = vsel %vm129_vm2, %v124_v14, %v130_v17 }
 0x119   :  { %v132_v20 = vpack.c.bf16 %v131_v19, %v131_v19 }
 0x11b   :  { %312 = vmatmul.mubr.bf16.vlgmr.msra.gmra.mrb[0].mxu1 %v132_v20 }
 0x1ee   :  { %v238_v22 = vpop.f32.mrb[0].mxu1 }
 0x1ef   :  { %v239_v23 = vadd.f32 %v266_v21, %v238_v22  ;;  %v313_v24 = vpop.f32.mrb[1].mxu1 }
 0x1f0   :  { %v241_v25 = vpop.f32.mrb[2].mxu1 }
 0x1f1   :  { %v244_v26 = vpack.c.bf16 %v239_v23, %v239_v23  ;;  %v314_v27 = vpop.f32.mrb[3].mxu1 }
 0x1f3   :  { %245 = vst [vmem:[#allocation8] sm:$0xf] %v244_v26 }
 0x1f4   :  { %410 = shalt.err (!%p407_p0)
}
 0x1f5   :  { %s411_s4 = scalar_lea.hbm %s530_s5, 64 }
 0x1f6   :  { %p412_p1 = scmp.ne.s32.totalorder %s530_s5, %s411_s4  ;;  %p415_p2 = scmp.lt.u32.totalorder %s411_s4, %s530_s5 }
 0x1f8   :  { %p417_p3 = pnand %p415_p2, %p412_p1 }
 0x1fa   :  { %420 = shalt.err (!%p417_p3)
}
 0x1fb   :  { %255 = dma.vmem_to_hbm [thread:$0]  %s253_s8, 64, %s530_s5, [#allocation4]  }
 0x1fc   :  { %425 = dma.done.wait [#allocation4], 64  }
 0x1fd   :  { %426 = vsyncadd [#allocation4], 4294967232 }
 0x1fe   :  { %259 = vsyncpa [#allocation3], 1 }
 0x1ff   :  { %260 = vsyncpa [#allocation6], 1 }
 0x200   :  { %261 = vsyncpa [#allocation4], 1 }

</bundles_post_ra>
